<compile_context>
chip_gen: v7x
topology: tpu7x:2x2x1
jax: 0.10.0
libtpu: 0.0.40
codegen_flags: <defaults>
</compile_context>

<pallas_src>
import functools

import jax
import jax.numpy as jnp
from jax import lax
from jax.experimental import pallas as pl
from jax.experimental.pallas import tpu as pltpu


def _conv_bn_relu_up_kernel(x_ref, wb_ref, shift_ref, o_ref, xpad_ref, acc_ref,
                            *, TH, WC, Wup, UP):
    """One (image, row-tile) step of fused conv3x3 + folded-BN + ReLU + 2x up.

    x_ref    : (H, W*Cin)          whole-image flattened input (lane-dense)
    wb_ref   : (3, W*Cin, Wup)     banded weights (scale folded, W-pad + W-up baked in)
    shift_ref: (1, Wup)            folded BN shift, tiled over flattened lanes
    o_ref    : (TH, UP*Wup)        lane-dense output row tile (H-up fused)
    xpad_ref : (TH+2, W*Cin) f32   VMEM halo scratch (H zero-padding)
    acc_ref  : (TH, Wup) f32       VMEM accumulator
    """
    t = pl.program_id(1)
    nt = pl.num_programs(1)
    row0 = pl.multiple_of(t * TH, TH)

    # Interior rows of the zero-padded (TH+2, W*Cin) window (pad=1 along H).
    xpad_ref[1:TH + 1, :] = x_ref[pl.ds(row0, TH), :].astype(jnp.float32)

    # Top halo row: zero at the image top, neighbor row otherwise.
    @pl.when(t == 0)
    def _():
        xpad_ref[0:1, :] = jnp.zeros((1, WC), jnp.float32)

    @pl.when(t > 0)
    def _():
        xpad_ref[0:1, :] = x_ref[pl.ds(row0 - 1, 1), :].astype(jnp.float32)

    # Bottom halo row: zero at the image bottom, neighbor row otherwise.
    @pl.when(t == nt - 1)
    def _():
        xpad_ref[TH + 1:TH + 2, :] = jnp.zeros((1, WC), jnp.float32)

    @pl.when(t < nt - 1)
    def _():
        xpad_ref[TH + 1:TH + 2, :] = x_ref[pl.ds(row0 + TH, 1), :].astype(
            jnp.float32)

    # 3 banded MXU matmuls (one per kernel row dy).  The W zero-padding and the
    # nearest W-upsample ride inside wb's band structure, so no per-tap
    # slice/reshape relayouts are needed.
    acc_ref[...] = jnp.dot(xpad_ref[0:TH, :], wb_ref[0],
                           preferred_element_type=jnp.float32)
    acc_ref[...] += jnp.dot(xpad_ref[1:TH + 1, :], wb_ref[1],
                            preferred_element_type=jnp.float32)
    acc_ref[...] += jnp.dot(xpad_ref[2:TH + 2, :], wb_ref[2],
                            preferred_element_type=jnp.float32)

    # Folded-BN shift + ReLU, then nearest H-upsample as UP duplicated
    # lane-dense stores (lane offsets are multiples of 128).
    y = jnp.maximum(acc_ref[...] + shift_ref[...], 0.0).astype(o_ref.dtype)
    for d in range(UP):
        o_ref[:, d * Wup:(d + 1) * Wup] = y


def _fold_and_band(w_hwio, scale, shift, W, up):
    """Fold BN scale into weights and build the banded per-dy matrices.

    Returns:
      band      : (3, W*Cin, up*W*Cout) banded weights; band[dy][wi*Cin+ci,
                  (up*wo+d)*Cout+co] = scale[co]*w[dy, wi-wo+1, ci, co] when
                  |wi-wo| <= 1, else 0 (implements pad=1 along W and the
                  nearest W-upsample).
      shift_flat: (1, up*W*Cout) folded BN shift tiled over flattened lanes.
    """
    kh, kw, Cin, Cout = w_hwio.shape
    w_scaled = w_hwio * scale[None, None, None, :]
    wi = jnp.arange(W)
    wo = jnp.arange(W)
    dx = jnp.arange(kw)
    # sel[dx, wi, wo] = 1 iff wi == wo + dx - 1  (3-tap band with pad=1)
    sel = (wi[None, :, None] == (wo[None, None, :] + dx[:, None, None] - 1))
    sel = sel.astype(w_hwio.dtype)
    bands = []
    for dy in range(kh):
        b4 = jnp.einsum("xio,xck->icok", sel, w_scaled[dy])   # (W,Cin,W,Cout)
        b4 = jnp.repeat(b4, up, axis=2)                       # (W,Cin,up*W,Cout)
        bands.append(b4.reshape(W * Cin, up * W * Cout))
    band = jnp.stack(bands, axis=0)
    shift_flat = jnp.tile(shift, up * W).reshape(1, up * W * Cout)
    return band, shift_flat


def conv_bn_relu_upsample(x_nhwc, w_hwio, scale, shift, up):
    """Fused 3x3 conv (stride 1, pad 1, no bias) + BN + ReLU + nearest up."""
    N, H, W, Cin = x_nhwc.shape
    Cout = w_hwio.shape[-1]
    band, shift_flat = _fold_and_band(w_hwio, scale, shift, W, up)

    WC = W * Cin
    Wup = up * W * Cout          # width of one ReLU'd (W-upsampled) row slab
    out_w = up * Wup             # H duplicates are packed along the lane dim
    TH = 8 if H % 8 == 0 else H  # row tile (sublane aligned); fallback: whole H
    T = H // TH

    x_flat = x_nhwc.reshape(N, H, WC)            # free row-major reshape

    kernel = functools.partial(_conv_bn_relu_up_kernel,
                               TH=TH, WC=WC, Wup=Wup, UP=up)
    out_flat = pl.pallas_call(
        kernel,
        out_shape=jax.ShapeDtypeStruct((N, H, out_w), x_nhwc.dtype),
        grid_spec=pltpu.PrefetchScalarGridSpec(
            num_scalar_prefetch=0,
            grid=(N, T),
            in_specs=[
                # Whole-image flattened input, resident across the row-tile axis
                # (DMA'd once per image, no padded HBM copy).
                pl.BlockSpec((None, H, WC), lambda n, t: (n, 0, 0)),
                pl.BlockSpec((3, WC, Wup), lambda n, t: (0, 0, 0)),
                pl.BlockSpec((1, Wup), lambda n, t: (0, 0)),
            ],
            out_specs=pl.BlockSpec((None, TH, out_w), lambda n, t: (n, t, 0)),
            scratch_shapes=[
                pltpu.VMEM((TH + 2, WC), jnp.float32),   # H-halo scratch
                pltpu.VMEM((TH, Wup), jnp.float32),      # f32 accumulator
            ],
        ),
        compiler_params=pltpu.CompilerParams(
            dimension_semantics=("parallel", "parallel")),
    )(x_flat, band, shift_flat)

    # Free row-major reinterpretation: (N, H, up*up*W*Cout) == (N, up*H, up*W, Cout)
    return out_flat.reshape(N, up * H, up * W, Cout)


def init_segmentation_block_params(key, in_channels, out_channels, n_upsamples):
    """Deterministic synthetic parameters (conv weights + eval-mode BN)."""
    n_convs = 1 if n_upsamples <= 1 else n_upsamples
    eps = 1e-5
    params = []
    cin = in_channels
    for _ in range(n_convs):
        key, k_w, k_g, k_b, k_m, k_v = jax.random.split(key, 6)
        # PyTorch Conv2d weight shape: (out, in, 3, 3) -> transpose to HWIO.
        w_oihw = 0.1 * jax.random.normal(k_w, (out_channels, cin, 3, 3),
                                         jnp.float32)
        gamma = 1.0 + 0.1 * jax.random.normal(k_g, (out_channels,), jnp.float32)
        beta = 0.1 * jax.random.normal(k_b, (out_channels,), jnp.float32)
        mean = 0.1 * jax.random.normal(k_m, (out_channels,), jnp.float32)
        var = jnp.abs(jax.random.normal(k_v, (out_channels,), jnp.float32)) + 0.5
        scale = gamma / jnp.sqrt(var + eps)
        shift = beta - mean * scale
        params.append(dict(
            w=jnp.transpose(w_oihw, (2, 3, 1, 0)),      # OIHW -> HWIO
            scale=scale,
            shift=shift,
        ))
        cin = out_channels
    return params


def segmentation_block_forward(x_nchw, params, n_upsamples):
    """Matches SegmentationBlock.forward: [Conv+BN+ReLU (+ Up2x)] * ..."""
    x = jnp.transpose(x_nchw, (0, 2, 3, 1))            # NCHW -> NHWC
    up = 2 if n_upsamples > 0 else 1
    for p in params:
        x = conv_bn_relu_upsample(x, p["w"], p["scale"], p["shift"], up)
    return jnp.transpose(x, (0, 3, 1, 2))              # NHWC -> NCHW


def reference_forward(x_nchw, params, n_upsamples):
    """Pure-JAX reference (lax.conv) for correctness checking."""
    x = jnp.transpose(x_nchw, (0, 2, 3, 1))
    for p in params:
        y = lax.conv_general_dilated(
            x, p["w"], window_strides=(1, 1), padding="SAME",
            dimension_numbers=("NHWC", "HWIO", "NHWC"))
        y = y * p["scale"].reshape(1, 1, 1, -1) + p["shift"].reshape(1, 1, 1, -1)
        y = jnp.maximum(y, 0.0)
        if n_upsamples > 0:
            y = jnp.repeat(jnp.repeat(y, 2, axis=1), 2, axis=2)
        x = y
    return jnp.transpose(x, (0, 3, 1, 2))


if __name__ == "__main__":
    key = jax.random.PRNGKey(0)
    k_x, k_p = jax.random.split(key)

    N, C_IN, C_OUT, H, W = 2, 4, 8, 16, 16
    N_UPSAMPLES = 2   # -> [Conv+BN+ReLU, Up2x, Conv+BN+ReLU, Up2x]

    x = jax.random.normal(k_x, (N, C_IN, H, W), jnp.float32)

    # Main case: two conv stages, each followed by a fused nearest 2x upsample.
    params = init_segmentation_block_params(k_p, C_IN, C_OUT, N_UPSAMPLES)
    out = jax.block_until_ready(segmentation_block_forward(x, params, N_UPSAMPLES))
    ref = reference_forward(x, params, N_UPSAMPLES)
    assert out.shape == (N, C_OUT, H * 4, W * 4), out.shape
    assert jnp.allclose(out, ref, atol=1e-3, rtol=1e-3), \
        float(jnp.max(jnp.abs(out - ref)))

    # No-upsample case (n_upsamples=0): single conv, no duplication (UP=1 path).
    params0 = init_segmentation_block_params(k_p, C_IN, C_OUT, 0)
    out0 = jax.block_until_ready(segmentation_block_forward(x, params0, 0))
    ref0 = reference_forward(x, params0, 0)
    assert out0.shape == (N, C_OUT, H, W), out0.shape
    assert jnp.allclose(out0, ref0, atol=1e-3, rtol=1e-3), \
        float(jnp.max(jnp.abs(out0 - ref0)))

    print("KERNEL_OK")
</pallas_src>

<mosaic_0001>
module attributes {stable_mosaic.version = 11 : i64} {
  func.func @_conv_bn_relu_up_kernel(%arg0: i32, %arg1: i32, %arg2: memref<1x16x64xf32, #tpu.memory_space<vmem>>, %arg3: memref<3x64x256xf32, #tpu.memory_space<vmem>>, %arg4: memref<1x256xf32, #tpu.memory_space<vmem>>, %arg5: memref<1x8x512xf32, #tpu.memory_space<vmem>>, %arg6: memref<10x64xf32, #tpu.memory_space<vmem>>, %arg7: memref<8x256xf32, #tpu.memory_space<vmem>>) attributes {dimension_semantics = [#tpu.dimension_semantics<parallel>, #tpu.dimension_semantics<parallel>], iteration_bounds = array<i64: 2, 2>, scalar_prefetch = 0 : i64, scratch_operands = 2 : i64, tpu.core_type = #tpu.core_type<tc>, window_params = [{transform_indices = @transform_0, window_bounds = array<i64: 1, 16, 64>}, {pipeline_mode = #tpu.pipeline_mode<synchronous>, transform_indices = @transform_1, window_bounds = array<i64: 3, 64, 256>}, {pipeline_mode = #tpu.pipeline_mode<synchronous>, transform_indices = @transform_2, window_bounds = array<i64: 1, 256>}, {transform_indices = @transform_3, window_bounds = array<i64: 1, 8, 512>}]} {
    %c8_i32 = arith.constant 8 : i32
    %0 = arith.muli %arg1, %c8_i32 : i32
    %1 = tpu.assume_multiple %0, 8 : i32
    %c0 = arith.constant 0 : index
    %2 = arith.index_cast %1 : i32 to index
    %c0_0 = arith.constant 0 : index
    %3 = vector.load %arg2[%c0, %2, %c0_0] : memref<1x16x64xf32, #tpu.memory_space<vmem>>, vector<1x8x64xf32>
    %4 = vector.shape_cast %3 : vector<1x8x64xf32> to vector<8x64xf32>
    %c1 = arith.constant 1 : index
    %c0_1 = arith.constant 0 : index
    %5 = vector.load %arg6[%c1, %c0_1] : memref<10x64xf32, #tpu.memory_space<vmem>>, vector<8x64xf32>
    tpu.vector_store %arg6[%c1, %c0_1], %4 {strides = array<i32>} : memref<10x64xf32, #tpu.memory_space<vmem>>, vector<8x64xf32>,
    %c0_i32 = arith.constant 0 : i32
    %6 = arith.cmpi eq, %arg1, %c0_i32 : i32
    %7 = arith.extui %6 : i1 to i32
    %c0_i32_2 = arith.constant 0 : i32
    %8 = arith.cmpi ne, %7, %c0_i32_2 : i32
    scf.if %8 {
      %cst_44 = arith.constant 0.000000e+00 : f32
      %49 = vector.broadcast %cst_44 : f32 to vector<1x64xf32>
      %c0_45 = arith.constant 0 : index
      %c0_46 = arith.constant 0 : index
      %50 = vector.load %arg6[%c0_45, %c0_46] : memref<10x64xf32, #tpu.memory_space<vmem>>, vector<1x64xf32>
      tpu.vector_store %arg6[%c0_45, %c0_46], %49 {strides = array<i32>} : memref<10x64xf32, #tpu.memory_space<vmem>>, vector<1x64xf32>,
    } else {
    }
    %c0_i32_3 = arith.constant 0 : i32
    %9 = arith.cmpi sgt, %arg1, %c0_i32_3 : i32
    %10 = arith.extui %9 : i1 to i32
    %c0_i32_4 = arith.constant 0 : i32
    %11 = arith.cmpi ne, %10, %c0_i32_4 : i32
    scf.if %11 {
      %c1_i32_44 = arith.constant 1 : i32
      %49 = arith.subi %1, %c1_i32_44 : i32
      %c0_45 = arith.constant 0 : index
      %50 = arith.index_cast %49 : i32 to index
      %c0_46 = arith.constant 0 : index
      %51 = vector.load %arg2[%c0_45, %50, %c0_46] : memref<1x16x64xf32, #tpu.memory_space<vmem>>, vector<1x1x64xf32>
      %52 = vector.shape_cast %51 : vector<1x1x64xf32> to vector<1x64xf32>
      %c0_47 = arith.constant 0 : index
      %c0_48 = arith.constant 0 : index
      %53 = vector.load %arg6[%c0_47, %c0_48] : memref<10x64xf32, #tpu.memory_space<vmem>>, vector<1x64xf32>
      tpu.vector_store %arg6[%c0_47, %c0_48], %52 {strides = array<i32>} : memref<10x64xf32, #tpu.memory_space<vmem>>, vector<1x64xf32>,
    } else {
    }
    %c1_i32 = arith.constant 1 : i32
    %12 = arith.cmpi eq, %arg1, %c1_i32 : i32
    %13 = arith.extui %12 : i1 to i32
    %c0_i32_5 = arith.constant 0 : i32
    %14 = arith.cmpi ne, %13, %c0_i32_5 : i32
    scf.if %14 {
      %cst_44 = arith.constant 0.000000e+00 : f32
      %49 = vector.broadcast %cst_44 : f32 to vector<1x64xf32>
      %c9 = arith.constant 9 : index
      %c0_45 = arith.constant 0 : index
      %50 = vector.load %arg6[%c9, %c0_45] : memref<10x64xf32, #tpu.memory_space<vmem>>, vector<1x64xf32>
      tpu.vector_store %arg6[%c9, %c0_45], %49 {strides = array<i32>} : memref<10x64xf32, #tpu.memory_space<vmem>>, vector<1x64xf32>,
    } else {
    }
    %c1_i32_6 = arith.constant 1 : i32
    %15 = arith.cmpi slt, %arg1, %c1_i32_6 : i32
    %16 = arith.extui %15 : i1 to i32
    %c0_i32_7 = arith.constant 0 : i32
    %17 = arith.cmpi ne, %16, %c0_i32_7 : i32
    scf.if %17 {
      %c8_i32_44 = arith.constant 8 : i32
      %49 = arith.addi %1, %c8_i32_44 : i32
      %c0_45 = arith.constant 0 : index
      %50 = arith.index_cast %49 : i32 to index
      %c0_46 = arith.constant 0 : index
      %51 = vector.load %arg2[%c0_45, %50, %c0_46] : memref<1x16x64xf32, #tpu.memory_space<vmem>>, vector<1x1x64xf32>
      %52 = vector.shape_cast %51 : vector<1x1x64xf32> to vector<1x64xf32>
      %c9 = arith.constant 9 : index
      %c0_47 = arith.constant 0 : index
      %53 = vector.load %arg6[%c9, %c0_47] : memref<10x64xf32, #tpu.memory_space<vmem>>, vector<1x64xf32>
      tpu.vector_store %arg6[%c9, %c0_47], %52 {strides = array<i32>} : memref<10x64xf32, #tpu.memory_space<vmem>>, vector<1x64xf32>,
    } else {
    }
    %c0_8 = arith.constant 0 : index
    %c0_9 = arith.constant 0 : index
    %18 = vector.load %arg6[%c0_8, %c0_9] : memref<10x64xf32, #tpu.memory_space<vmem>>, vector<8x64xf32>
    %c0_10 = arith.constant 0 : index
    %c0_11 = arith.constant 0 : index
    %c0_12 = arith.constant 0 : index
    %19 = vector.load %arg3[%c0_10, %c0_11, %c0_12] : memref<3x64x256xf32, #tpu.memory_space<vmem>>, vector<1x64x256xf32>
    %20 = vector.shape_cast %19 : vector<1x64x256xf32> to vector<64x256xf32>
    %cst = arith.constant dense<0.000000e+00> : vector<8x256xf32>
    %21 = tpu.matmul %18, %20, %cst {dimension_numbers = #tpu.dot_dimension_numbers<[1], [0], [0], [1], [0, 0, 1, 1], [], []>} : vector<8x64xf32>, vector<64x256xf32>, vector<8x256xf32> -> vector<8x256xf32>
    %c0_13 = arith.constant 0 : index
    %c0_14 = arith.constant 0 : index
    %22 = vector.load %arg7[%c0_13, %c0_14] : memref<8x256xf32, #tpu.memory_space<vmem>>, vector<8x256xf32>
    tpu.vector_store %arg7[%c0_13, %c0_14], %21 {strides = array<i32>} : memref<8x256xf32, #tpu.memory_space<vmem>>, vector<8x256xf32>,
    %c0_15 = arith.constant 0 : index
    %c0_16 = arith.constant 0 : index
    %23 = vector.load %arg7[%c0_15, %c0_16] : memref<8x256xf32, #tpu.memory_space<vmem>>, vector<8x256xf32>
    %c1_17 = arith.constant 1 : index
    %c0_18 = arith.constant 0 : index
    %24 = vector.load %arg6[%c1_17, %c0_18] : memref<10x64xf32, #tpu.memory_space<vmem>>, vector<8x64xf32>
    %c1_19 = arith.constant 1 : index
    %c0_20 = arith.constant 0 : index
    %c0_21 = arith.constant 0 : index
    %25 = vector.load %arg3[%c1_19, %c0_20, %c0_21] : memref<3x64x256xf32, #tpu.memory_space<vmem>>, vector<1x64x256xf32>
    %26 = vector.shape_cast %25 : vector<1x64x256xf32> to vector<64x256xf32>
    %cst_22 = arith.constant dense<0.000000e+00> : vector<8x256xf32>
    %27 = tpu.matmul %24, %26, %cst_22 {dimension_numbers = #tpu.dot_dimension_numbers<[1], [0], [0], [1], [0, 0, 1, 1], [], []>} : vector<8x64xf32>, vector<64x256xf32>, vector<8x256xf32> -> vector<8x256xf32>
    %28 = arith.addf %23, %27 : vector<8x256xf32>
    %c0_23 = arith.constant 0 : index
    %c0_24 = arith.constant 0 : index
    %29 = vector.load %arg7[%c0_23, %c0_24] : memref<8x256xf32, #tpu.memory_space<vmem>>, vector<8x256xf32>
    tpu.vector_store %arg7[%c0_23, %c0_24], %28 {strides = array<i32>} : memref<8x256xf32, #tpu.memory_space<vmem>>, vector<8x256xf32>,
    %c0_25 = arith.constant 0 : index
    %c0_26 = arith.constant 0 : index
    %30 = vector.load %arg7[%c0_25, %c0_26] : memref<8x256xf32, #tpu.memory_space<vmem>>, vector<8x256xf32>
    %c2 = arith.constant 2 : index
    %c0_27 = arith.constant 0 : index
    %31 = vector.load %arg6[%c2, %c0_27] : memref<10x64xf32, #tpu.memory_space<vmem>>, vector<8x64xf32>
    %c2_28 = arith.constant 2 : index
    %c0_29 = arith.constant 0 : index
    %c0_30 = arith.constant 0 : index
    %32 = vector.load %arg3[%c2_28, %c0_29, %c0_30] : memref<3x64x256xf32, #tpu.memory_space<vmem>>, vector<1x64x256xf32>
    %33 = vector.shape_cast %32 : vector<1x64x256xf32> to vector<64x256xf32>
    %cst_31 = arith.constant dense<0.000000e+00> : vector<8x256xf32>
    %34 = tpu.matmul %31, %33, %cst_31 {dimension_numbers = #tpu.dot_dimension_numbers<[1], [0], [0], [1], [0, 0, 1, 1], [], []>} : vector<8x64xf32>, vector<64x256xf32>, vector<8x256xf32> -> vector<8x256xf32>
    %35 = arith.addf %30, %34 : vector<8x256xf32>
    %c0_32 = arith.constant 0 : index
    %c0_33 = arith.constant 0 : index
    %36 = vector.load %arg7[%c0_32, %c0_33] : memref<8x256xf32, #tpu.memory_space<vmem>>, vector<8x256xf32>
    tpu.vector_store %arg7[%c0_32, %c0_33], %35 {strides = array<i32>} : memref<8x256xf32, #tpu.memory_space<vmem>>, vector<8x256xf32>,
    %c0_34 = arith.constant 0 : index
    %c0_35 = arith.constant 0 : index
    %37 = vector.load %arg7[%c0_34, %c0_35] : memref<8x256xf32, #tpu.memory_space<vmem>>, vector<8x256xf32>
    %c0_36 = arith.constant 0 : index
    %c0_37 = arith.constant 0 : index
    %38 = vector.load %arg4[%c0_36, %c0_37] : memref<1x256xf32, #tpu.memory_space<vmem>>, vector<1x256xf32>
    %39 = vector.broadcast %38 : vector<1x256xf32> to vector<8x256xf32>
    %40 = arith.addf %37, %39 : vector<8x256xf32>
    %cst_38 = arith.constant 0.000000e+00 : f32
    %41 = vector.broadcast %cst_38 : f32 to vector<8x256xf32>
    %42 = arith.maximumf %40, %41 : vector<8x256xf32>
    %c0_39 = arith.constant 0 : index
    %c0_40 = arith.constant 0 : index
    %c0_41 = arith.constant 0 : index
    %43 = vector.load %arg5[%c0_39, %c0_40, %c0_41] : memref<1x8x512xf32, #tpu.memory_space<vmem>>, vector<1x8x256xf32>
    %44 = vector.shape_cast %43 : vector<1x8x256xf32> to vector<8x256xf32>
    %45 = vector.shape_cast %42 : vector<8x256xf32> to vector<1x8x256xf32>
    tpu.vector_store %arg5[%c0_39, %c0_40, %c0_41], %45 {strides = array<i32>} : memref<1x8x512xf32, #tpu.memory_space<vmem>>, vector<1x8x256xf32>,
    %c0_42 = arith.constant 0 : index
    %c0_43 = arith.constant 0 : index
    %c256 = arith.constant 256 : index
    %46 = vector.load %arg5[%c0_42, %c0_43, %c256] : memref<1x8x512xf32, #tpu.memory_space<vmem>>, vector<1x8x256xf32>
    %47 = vector.shape_cast %46 : vector<1x8x256xf32> to vector<8x256xf32>
    %48 = vector.shape_cast %42 : vector<8x256xf32> to vector<1x8x256xf32>
    tpu.vector_store %arg5[%c0_42, %c0_43, %c256], %48 {strides = array<i32>} : memref<1x8x512xf32, #tpu.memory_space<vmem>>, vector<1x8x256xf32>,
    return
  }
  func.func @transform_0(%arg0: i32, %arg1: i32) -> (i32, i32, i32) {
    %c0_i32 = arith.constant 0 : i32
    %c0_i32_0 = arith.constant 0 : i32
    %c0_i32_1 = arith.constant 0 : i32
    return %arg0, %c0_i32, %c0_i32_0 : i32, i32, i32
  }
  func.func @transform_1(%arg0: i32, %arg1: i32) -> (i32, i32, i32) {
    %c0_i32 = arith.constant 0 : i32
    %c0_i32_0 = arith.constant 0 : i32
    %c0_i32_1 = arith.constant 0 : i32
    %c0_i32_2 = arith.constant 0 : i32
    return %c0_i32, %c0_i32_0, %c0_i32_1 : i32, i32, i32
  }
  func.func @transform_2(%arg0: i32, %arg1: i32) -> (i32, i32) {
    %c0_i32 = arith.constant 0 : i32
    %c0_i32_0 = arith.constant 0 : i32
    %c0_i32_1 = arith.constant 0 : i32
    return %c0_i32, %c0_i32_0 : i32, i32
  }
  func.func @transform_3(%arg0: i32, %arg1: i32) -> (i32, i32, i32) {
    %c0_i32 = arith.constant 0 : i32
    %c0_i32_0 = arith.constant 0 : i32
    return %arg0, %arg1, %c0_i32 : i32, i32, i32
  }
}

</mosaic_0001>

<bundles_post_ra>
// kernel: tpu_custom_call.1
= control target key start
LH: loop header
LB: loop body
LE: loop exit
PB: predicated region body
PF: predicated region fallthrough
CT: control target
= control target key end

     0   :  { %s1386_s0 = inlined_call_operand.hbm [shape: f32[2,16,64], index: 0, kind: input, shape index: {}]   ;;  %s1387_s1 = inlined_call_operand.hbm [shape: f32[3,64,256], index: 1, kind: input, shape index: {}]   ;;  %s1388_s2 = inlined_call_operand.vmem [shape: f32[1,256], index: 2, kind: input, shape index: {}]   ;;  %s1389_s3 = inlined_call_operand.hbm [shape: f32[2,16,512], index: 3, kind: output, shape index: {}]  }
   0x1   :  { %1400 = sst [smem:[#allocation18_spill]] %s1387_s1 }
   0x2   :  { %8 = vsyncpa [#allocation5], 0 }
   0x3   :  { %10 = vsyncpa [#allocation5 + $0x1], 0 }
   0x4   :  { %11 = vsyncpa [#allocation8], 0 }
   0x5   :  { %12 = vsyncpa [#allocation6], 0 }
   0x6   :  { %14 = vsyncpa [#allocation6 + $0x1], 0  ;;  %s1099_s12 = smov 0   ;;  %s1101_s13 = smov 0  }
   0x7   :  { %s1103_s14 = smov 0   ;;  %s1105_s15 = smov 0  }
   0x8   :  { %s1107_s16 = smov 0   ;;  %s1109_s17 = smov 0  }
   0x9   :  { %s1111_s18 = smov 0   ;;  %s1113_s19 = smov 0  }
   0xa   :  { %s1115_s20 = smov 0   ;;  %s1117_s21 = smov 0  }
   0xb   :  { %s1119_s22 = smov 0  }
   0xc LB: > { %1401 = sst [smem:[#allocation13_spill]] %s1027_s12  ;;  %s681_s23 = sadd.s32 4294967295, %s1067_s22   ;;  %s1067_s22 = sphi %s1119_s22, %s20_s22   ;;  %s1063_s21 = sphi %s1117_s21, %s1432_s21   ;;  %s1059_s20 = sphi %s1115_s20, %s1423_s20   ;;  %s1055_s19 = sphi %s1113_s19, %s1431_s19   ;;  %s1051_s18 = sphi %s1111_s18, %s1422_s18   ;;  %s1047_s17 = sphi %s1109_s17, %s1430_s17   ;;  %s1043_s16 = sphi %s1107_s16, %s1429_s16   ;;  %s1039_s15 = sphi %s1105_s15, %s1428_s15   ;;  %s1035_s14 = sphi %s1103_s14, %s1427_s14   ;;  %s1031_s13 = sphi %s1101_s13, %s1426_s13   ;;  %s1027_s12 = sphi %s1099_s12, %s1425_s12  }
   0xd   : > { %1402 = sst [smem:[#allocation14_spill]] %s1059_s20  ;;  %s682_s24 = sadd.s32 4294967294, %s1067_s22  }
   0xe   : > { %p52_p0 = scmp.ne.s32.totalorder %s1043_s16, %s1039_s15  ;;  %p1155_p1 = scmp.eq.s32.totalorder %s681_s23, 0 }
   0xf   : > { %s109_s26 = sadd.s32 1, %s1035_s14  ;;  %p119_p2 = scmp.ne.s32.totalorder %s1035_s14, %s1031_s13 }
  0x10   : > { %s1403_s25 = scalar_select %p1155_p1, 1, 0 }
  0x11   : > { %p1164_p3 = por %p1155_p1, %p52_p0  ;;  %p120_p4 = scmp.eq.s32.totalorder %s681_s23, 3 }
  0x12   : > { %p125_p5 = scmp.ne.s32.totalorder %s1031_s13, %s1027_s12  ;;  %p126_p6 = scmp.eq.s32.totalorder %s682_s24, 3 }
  0x13   : > { %s1404_s27 = scalar_select %p1164_p3, 1, 0 }
  0x14   : > { %p1170_p7 = por %p120_p4, %p119_p2  ;;  %p683_p8 = scmp.ge.s32.totalorder %s1067_s22, 1 }
  0x15   : > { %p1175_p9 = por %p126_p6, %p125_p5  ;;  %p133_p10 = scmp.lt.s32.totalorder %s1067_s22, 5 }
  0x16   : > { %s1405_s28 = scalar_select %p1170_p7, 1, 0 }
  0x17   : > { %s1406_s29 = scalar_select %p1175_p9, 1, 0 }
  0x18   : > { %p1180_p11 = pnand %p683_p8, %p133_p10  ;;  %s1069_s4 = smov [#allocation7]  }
  0x19   : > { %1407 = sst [smem:[#allocation15_spill]] %s1406_s29  ;;  %s145_s5 = sshll.u32 %s1069_s4, 4  ;;  %s146_s5 = int_to_ptr.vmem [resolvable:$true] %s145_s5 }
  0x1a   : > { %s1408_s30 = scalar_select %p1180_p11, 1, 0 }
  0x1b   : > { %p771_p12 = pneg %p1180_p11  ;;  %s1410_s1 = sld [smem:[#allocation18_spill]] }
  0x1d   : > { %p1188_p13 = pnand %p771_p12, %p1155_p1 }
  0x1f   : > { %p885_p2 = pneg %p1188_p13 }
  0x21   : > { %s883_s9 = scalar_lea.hbm %s1410_s1, 6144 }
  0x22   : > { %p884_p0 = scmp.ne.s32.totalorder %s1410_s1, %s883_s9  ;;  %p890_p6 = scmp.lt.u32.totalorder %s883_s9, %s1410_s1 }
  0x24   : > { %p886_p4 = pnand %p885_p2, %p884_p0 }
  0x26   : > { %p887_p5 = pneg %p886_p4 }
  0x28   : > { %p892_p8 = pnand %p890_p6, %p887_p5 }
  0x2a   : > { %895 = shalt.err (!%p892_p8)
}
  0x2b   : > { %s896_s24 = scalar_lea.vmem %s146_s5, 6144  ;;  %p904_p7 = scmp.lt.s32.totalorder %s146_s5, %s146_s5 }
  0x2c   : > { %p897_p10 = scmp.ne.s32.totalorder %s146_s5, %s896_s24  ;;  %p905_p1 = scmp.lt.s32.totalorder %s896_s24, %s896_s24 }
  0x2e   : > { %p899_p12 = pnand %p897_p10, %p885_p2  ;;  %p906_p3 = por %p905_p1, %p904_p7 }
  0x30   : > { %p900_p9 = pneg %p899_p12 }
  0x32   : > { %p907_p11 = pnand %p906_p3, %p900_p9 }
  0x34   : > { %910 = shalt.err (!%p907_p11)
}
  0x35   : > { %s1070_s4 = smov 256   ;;  %s1071_s7 = smov 16  }
  0x36   : > { %774 = dma.hbm_to_vmem [thread:$0]  (!%p1188_p13), %s1410_s1, 6144, %s146_s5, [#allocation8], %s1070_s4, %s1070_s4, %s1071_s7  }
  0x37   : > { %s29_s10 = sadd.s32 1, %s1059_s20  ;;  %s32_s11 = sadd.s32 1, %s1063_s21 }
  0x38   : > { %p30_p1 = scmp.ge.s32.totalorder %s29_s10, 2  ;;  %s39_s15 = sadd.s32 1, %s1047_s17 }
  0x39   : > { %p46_p3 = scmp.ne.s32.totalorder %s1047_s17, %s1043_s16  ;;  %p47_p7 = scmp.eq.s32.totalorder %s1067_s22, 0 }
  0x3a   : > { %s1434_s10 = smov (%p30_p1, %s29_s10), 0  ;;  %s1436_s11 = smov (!%p30_p1, %s32_s11), %s1063_s21 }
  0x3b   : > { %1411 = sst [smem:[#allocation16_spill]] %s1434_s10  ;;  %s105_s6 = ssub.s32 %s1059_s20, %s1434_s10 }
  0x3c   : > { %p34_p9 = scmp.ge.s32.totalorder %s1436_s11, 2  ;;  %p784_p11 = scmp.lt.s32.totalorder %s1067_s22, 4 }
  0x3d   : > { %p1220_p13 = por %p47_p7, %p46_p3  ;;  %s162_s23 = sand.u32 1, %s1047_s17  }
  0x3e   : > { %s1438_s11 = smov (%p34_p9, %s1436_s11), 0  ;;  %s686_s24 = sshll.u32 %s162_s23, 4 }
  0x3f   : > { %1413 = sst [smem:[#allocation17_spill]] %s1438_s11  ;;  %s36_s4 = ssub.s32 %s1063_s21, %s1438_s11 }
  0x40   : > { %p37_p0 = scmp.eq.s32.totalorder %s36_s4, 0  ;;  %s106_s7 = sor.u32 %s105_s6, %s36_s4 }
  0x41   : > { %p107_p2 = scmp.eq.s32.totalorder %s106_s7, 0  ;;  %s710_s8 = sshll.u32 %s1063_s21, 8 }
  0x42   : > { %s1231_s9 = scalar_select %p37_p0, %s1047_s17, %s39_s15  }
  0x43   : > { %s1236_s1 = scalar_select %p107_p2, %s1035_s14, %s109_s26  }
  0x44   : > { %s1241_s29 = scalar_lea.hbm %s1386_s0, %s710_s8  ;;  %s166_s12 = scalar_lea.vmem [#allocation4], %s686_s24 }
  0x45   : > { %s173_s11 = sshll.u32 %s166_s12, 4  ;;  %p1249_p4 = pnand %p784_p11, %p1220_p13  ;;  %s1243_s11 = int_to_ptr.vmem [resolvable:$true] %s173_s11 }
  0x46   : > { %s1253_s26 = scalar_lea.sflag [#allocation5], %s162_s23  ;;  %s911_s20 = scalar_lea.hbm %s1241_s29, 256 }
  0x47   : > { %p912_p5 = scmp.ne.s32.totalorder %s1241_s29, %s911_s20  ;;  %p913_p6 = pneg %p1249_p4 }
  0x48   : > { %s916_s6 = scalar_lea.hbm %s1386_s0, 512  ;;  %p917_p12 = scmp.lt.u32.totalorder %s1241_s29, %s1386_s0 }
  0x49   : > { %p914_p8 = pnand %p913_p6, %p912_p5  ;;  %p918_p1 = scmp.lt.u32.totalorder %s916_s6, %s911_s20 }
  0x4a   : > { %p920_p7 = scmp.lt.u32.totalorder %s911_s20, %s1241_s29 }
  0x4b   : > { %p915_p10 = pneg %p914_p8  ;;  %p919_p3 = por %p918_p1, %p917_p12 }
  0x4d   : > { %p921_p9 = por %p920_p7, %p919_p3 }
  0x4f   : > { %p922_p11 = pnand %p921_p9, %p915_p10 }
  0x51   : > { %925 = shalt.err (!%p922_p11)
}
  0x52   : > { %s926_s23 = scalar_lea.vmem %s1243_s11, 256  ;;  %s1072_s4 = smov [#allocation4]  }
  0x53   : > { %p927_p13 = scmp.ne.s32.totalorder %s1243_s11, %s926_s23  ;;  %s931_s7 = sshll.u32 %s1072_s4, 4  ;;  %s932_s7 = int_to_ptr.vmem [resolvable:$false] %s931_s7 }
  0x54   : > { %s933_s8 = scalar_lea.vmem %s932_s7, 512  ;;  %p934_p5 = scmp.lt.s32.totalorder %s1243_s11, %s932_s7 }
  0x55   : > { %p929_p0 = pnand %p927_p13, %p913_p6  ;;  %p935_p8 = scmp.lt.s32.totalorder %s933_s8, %s926_s23 }
  0x57   : > { %p930_p2 = pneg %p929_p0  ;;  %p936_p12 = por %p935_p8, %p934_p5 }
  0x59   : > { %p937_p1 = pnand %p936_p12, %p930_p2 }
  0x5b   : > { %940 = shalt.err (!%p937_p1)
}
  0x5c   : > { %s1073_s20 = smov 128   ;;  %s1074_s12 = smov 8  }
  0x5d   : > { %778 = dma.hbm_to_vmem [thread:$0]  (!%p1249_p4), %s1241_s29, 256, %s1243_s11, %s1253_s26, %s1073_s20, %s1073_s20, %s1074_s12  }
  0x5e   : > { %p1415_p6 = scmp.ne.s32.totalorder %s1408_s30, 0 }
  0x5f   : > { %s187_s10 = sand.u32 (!%p1415_p6), 1, %s1043_s16   ;;  %p1416_p10 = scmp.ne.s32.totalorder (!%p1415_p6), %s1404_s27, 0 }
  0x60   : > { %185 = sbr.rel (%p1415_p6) target bundleno = 413 (0x19d), region = 32  ;;  %s690_s6 = sshll.u32 (!%p1415_p6), %s187_s10, 4 }
  0x61   : > { %s188_s5 = scalar_lea.sflag (!%p1415_p6), [#allocation5], %s187_s10  ;;  %s191_s24 = scalar_lea.vmem (!%p1415_p6), [#allocation4], %s690_s6 }
  0x67   : > { %1014 = dma.done.wait (%p1416_p10), %s188_s5, 256  }
  0x68   : > { %1016 = vsyncadd (%p1416_p10), %s188_s5, 4294967040  ;;  %p1417_p3 = scmp.ne.s32.totalorder %s1403_s25, 0 }
  0x6a   : > { %1018 = dma.done.wait (%p1417_p3), [#allocation8], 6144  }
  0x6b   : > { %1020 = vsyncadd (%p1417_p3), [#allocation8], 4294961152  ;;  %s215_s29 = sand.u32 1, %s1031_s13   ;;  %s693_s11 = sshll.u32 %s1051_s18, 3  ;;  %vm221_vm0 = vcmask 523264  }
  0x6c   : > { %s692_s30 = sshll.u32 %s215_s29, 5  ;;  %s219_s15 = scalar_lea.vmem %s191_s24, %s693_s11 [#allocation4] }
  0x6d   : > { %v220_v0 = vld [vmem:[%s219_s15] sm:$0xff]  ;;  %s1297_s27 = scalar_lea.vmem [#allocation9], %s692_s30  ;;  %p694_p4 = scmp.ne.s32.totalorder %s1051_s18, 0 }
  0x6e   : > { %222 = vst.msk [vmem:[#allocation2 + $0x1] sm:$0xff] %vm221_vm0, %v220_v0  ;;  %vm227_vm1 = vcmask (!%p694_p4), 516096   ;;  %v1075_v1 = vmov (!%p694_p4), 0.0  }
  0x6f   : > { %226 = sbr.rel (%p694_p4) target bundleno = 118 (0x76), region = 44  ;;  %228 = vst.msk [vmem:[#allocation2] sm:$0x1] (!%p694_p4), %vm227_vm1, %v1075_v1 }
  0x76 PF: > { %p695_p7 = scmp.le.s32.totalorder %s1051_s18, 0 }
  0x77   : > { %s696_s25 = sadd.s32 (!%p695_p7), 4294967295, %s693_s11  ;;  %vm236_vm2 = vcmask (!%p695_p7), 516096  }
  0x78   : > { %232 = sbr.rel (%p695_p7) target bundleno = 127 (0x7f), region = 48  ;;  %s234_s26 = scalar_lea.vmem (!%p695_p7), %s191_s24, %s696_s25 [#allocation4] }
  0x79   : > { %v235_v2 = vld [vmem:[%s234_s26] sm:$0x1] (!%p695_p7) }
  0x7a   : > { %237 = vst.msk [vmem:[#allocation2] sm:$0x1] (!%p695_p7), %vm236_vm2, %v235_v2 }
  0x7f PF: > { %p697_p9 = scmp.ne.s32.totalorder %s1051_s18, 1 }
  0x80   : > { %vm242_vm3 = vcmask (!%p697_p9), 516096   ;;  %v1076_v3 = vmov (!%p697_p9), 0.0  }
  0x81   : > { %241 = sbr.rel (%p697_p9) target bundleno = 136 (0x88), region = 52  ;;  %243 = vst.msk [vmem:[#allocation2 + $0x9] sm:$0x1] (!%p697_p9), %vm242_vm3, %v1076_v3 }
  0x88 PF: > { %p698_p11 = scmp.ge.s32.totalorder %s1051_s18, 1 }
  0x89   : > { %v700_v4 = vld [vmem:[%s219_s15 + $0x8] sm:$0x1] (!%p698_p11)  ;;  %vm251_vm4 = vcmask (!%p698_p11), 516096  }
  0x8a   : > { %247 = sbr.rel (%p698_p11) target bundleno = 145 (0x91), region = 56  ;;  %252 = vst.msk [vmem:[#allocation2 + $0x9] sm:$0x1] (!%p698_p11), %vm251_vm4, %v700_v4 }
  0x91 PF: > { %v351_v5 = vld [vmem:[#allocation7 + $0x88] sm:$0xff]  ;;  %v353_v6 = vld [vmem:[#allocation7 + $0x98] sm:$0xff]  ;;  %v350_v7 = vld [vmem:[#allocation7 + $0x80] sm:$0xff]  ;;  %v1077_v12 = vmov 0.0   ;;  %s705_s7 = sshll.u32 %s1051_s18, 2  ;;  %s706_s8 = sshll.u32 %s1055_s19, 3 }
  0x92   : > { %v727_v8 = vpack.c.bf16 %v353_v6, %v351_v5  ;;  %v352_v9 = vld [vmem:[#allocation7 + $0x90] sm:$0xff]  ;;  %v355_v10 = vld [vmem:[#allocation7 + $0xa8] sm:$0xff]  ;;  %v357_v11 = vld [vmem:[#allocation7 + $0xb8] sm:$0xff]  ;;  %433 = vmatprep.mubr.f32.mxu0 %v1077_v12  ;;  %337 = vmatprep.mubr.f32.mxu1 %v1077_v12  ;;  %s577_s20 = sadd.s32 %s706_s8, %s705_s7  ;;  %s581_s10 = sshll.u32 %s1297_s27, 4  ;;  %s1320_s10 = int_to_ptr.vmem [resolvable:$true] %s581_s10 }
  0x93   : > { %v729_v13 = vpack.c.bf16 %v352_v9, %v350_v7  ;;  %v731_v14 = vpack.c.bf16 %v357_v11, %v355_v10  ;;  %v354_v15 = vld [vmem:[#allocation7 + $0xa0] sm:$0xff]  ;;  %v356_v16 = vld [vmem:[#allocation7 + $0xb0] sm:$0xff]  ;;  %v359_v17 = vld [vmem:[#allocation7 + $0xc8] sm:$0xff]  ;;  %s707_s12 = sshll.u32 %s577_s20, 7  ;;  %s565_s5 = scalar_lea.sflag [#allocation6], %s215_s29 }
  0x94   : > { %728 = vmatprep.subr.bf16.mxu0 %v727_v8  ;;  %v361_v18 = vld [vmem:[#allocation7 + $0xd8] sm:$0xff]  ;;  %v733_v19 = vpack.c.bf16 %v356_v16, %v354_v15  ;;  %v358_v20 = vld [vmem:[#allocation7 + $0xc0] sm:$0xff]  ;;  %v360_v21 = vld [vmem:[#allocation7 + $0xd0] sm:$0xff]  ;;  %s1318_s6 = scalar_lea.hbm %s1389_s3, %s707_s12  ;;  %s941_s24 = scalar_lea.vmem %s1320_s10, 512 }
  0x95   : > { %730 = vmatpush1.bf16.msra.mxu0 %v729_v13  ;;  %v735_v22 = vpack.c.bf16 %v361_v18, %v359_v17  ;;  %v363_v23 = vld [vmem:[#allocation7 + $0xe8] sm:$0xff]  ;;  %v257_v25 = vld [vmem:[#allocation7 + $0x18] sm:$0xff]  ;;  %v254_v28 = vld [vmem:[#allocation7] sm:$0xff]  ;;  %v737_v31 = vpack.c.bf16 %v360_v21, %v358_v20  ;;  %v546_v17 = vlaneseq  ;;  %p942_p13 = scmp.ne.s32.totalorder %s1320_s10, %s941_s24  ;;  %p1418_p0 = scmp.ne.s32.totalorder %s1405_s28, 0 }
  0x96   : > { %732 = vmatprep.subr.bf16.mxu0 %v731_v14  ;;  %v255_v24 = vld [vmem:[#allocation7 + $0x8] sm:$0xff]  ;;  %v365_v26 = vld [vmem:[#allocation7 + $0xf8] sm:$0xff]  ;;  %v256_v29 = vld [vmem:[#allocation7 + $0x10] sm:$0xff]  ;;  %s1078_s30 = smov [#allocation9]  }
  0x97   : > { %v711_v27 = vpack.c.bf16 %v257_v25, %v255_v24  ;;  %v713_v30 = vpack.c.bf16 %v256_v29, %v254_v28  ;;  %v362_v32 = vld [vmem:[#allocation7 + $0xe0] sm:$0xff]  ;;  %v259_v33 = vld [vmem:[#allocation7 + $0x28] sm:$0xff]  ;;  %v261_v34 = vld [vmem:[#allocation7 + $0x38] sm:$0xff]  ;;  %v739_v35 = vpack.c.bf16 %v365_v26, %v363_v23  ;;  %v547_v20 = vshrl.u32 %v546_v17, 7  ;;  %p943_p2 = pnand %p942_p13, %p1418_p0  ;;  %s945_s11 = sshll.u32 %s1078_s30, 4  ;;  %s946_s11 = int_to_ptr.vmem [resolvable:$false] %s945_s11 }
  0x98   : > { %v364_v36 = vld [vmem:[#allocation7 + $0xf0] sm:$0xff]  ;;  %v715_v37 = vpack.c.bf16 %v261_v34, %v259_v33  ;;  %v258_v38 = vld [vmem:[#allocation7 + $0x20] sm:$0xff]  ;;  %v449_v40 = vld [vmem:[#allocation7 + $0x108] sm:$0xff]  ;;  %s947_s15 = scalar_lea.vmem %s946_s11, 1024  ;;  %p948_p8 = scmp.lt.s32.totalorder %s1320_s10, %s946_s11 }
  0x99   : > { %734 = vmatpush1.bf16.msra.mxu0 %v733_v19  ;;  %712 = vmatprep.subr.bf16.mxu1 %v711_v27  ;;  %v260_v39 = vld [vmem:[#allocation7 + $0x30] sm:$0xff]  ;;  %v451_v41 = vld [vmem:[#allocation7 + $0x118] sm:$0xff]  ;;  %v263_v43 = vld [vmem:[#allocation7 + $0x48] sm:$0xff]  ;;  %v741_v46 = vpack.c.bf16 %v364_v36, %v362_v32  ;;  %v548_v21 = vsub.s32 0, %v547_v20  ;;  %v552_v23 = vsub.s32 1, %v547_v20  ;;  %p944_p5 = pneg %p943_p2  ;;  %p949_p12 = scmp.lt.s32.totalorder %s947_s15, %s941_s24 }
  0x9a   : > { %736 = vmatprep.subr.bf16.mxu0 %v735_v22  ;;  %714 = vmatpush1.bf16.msra.mxu1 %v713_v30  ;;  %v717_v42 = vpack.c.bf16 %v260_v39, %v258_v38  ;;  %v265_v44 = vld [vmem:[#allocation7 + $0x58] sm:$0xff]  ;;  %v262_v45 = vld [vmem:[#allocation7 + $0x40] sm:$0xff]  ;;  %v450_v48 = vld [vmem:[#allocation7 + $0x110] sm:$0xff]  ;;  %v743_v51 = vpack.c.bf16 %v451_v41, %v449_v40 }
  0x9b   : > { %716 = vmatprep.subr.bf16.mxu1 %v715_v37  ;;  %v448_v47 = vld [vmem:[#allocation7 + $0x100] sm:$0xff]  ;;  %v719_v49 = vpack.c.bf16 %v265_v44, %v263_v43  ;;  %v264_v50 = vld [vmem:[#allocation7 + $0x50] sm:$0xff]  ;;  %v453_v52 = vld [vmem:[#allocation7 + $0x128] sm:$0xff]  ;;  %p950_p1 = por %p949_p12, %p948_p8 }
  0x9c   : > { %v455_v53 = vld [vmem:[#allocation7 + $0x138] sm:$0xff]  ;;  %v721_v54 = vpack.c.bf16 %v264_v50, %v262_v45  ;;  %v267_v55 = vld [vmem:[#allocation7 + $0x68] sm:$0xff]  ;;  %v266_v57 = vld [vmem:[#allocation7 + $0x60] sm:$0xff]  ;;  %v745_v61 = vpack.c.bf16 %v450_v48, %v448_v47 }
  0x9d   : > { %738 = vmatpush1.bf16.msra.mxu0 %v737_v31  ;;  %v269_v56 = vld [vmem:[#allocation7 + $0x78] sm:$0xff]  ;;  %v268_v58 = vld [vmem:[#allocation7 + $0x70] sm:$0xff]  ;;  %v747_v62 = vpack.c.bf16 %v455_v53, %v453_v52  ;;  %v452_v63 = vld [vmem:[#allocation7 + $0x120] sm:$0xff]  ;;  %p951_p6 = pnand %p950_p1, %p944_p5 }
  0x9e   : > { %740 = vmatprep.subr.bf16.mxu0 %v739_v35  ;;  %718 = vmatpush1.bf16.msra.mxu1 %v717_v42  ;;  %v723_v59 = vpack.c.bf16 %v269_v56, %v267_v55  ;;  %v348_v60 = vld [vmem:[#allocation2 + $0x1] sm:$0xff]  ;;  %v725_v1 = vpack.c.bf16 %v268_v58, %v266_v57  ;;  %v457_v2 = vld [vmem:[#allocation7 + $0x148] sm:$0xff]  ;;  %v456_v6 = vld [vmem:[#allocation7 + $0x140] sm:$0xff] }
  0x9f   : > { %720 = vmatprep.subr.bf16.mxu1 %v719_v49  ;;  %v454_v0 = vld [vmem:[#allocation7 + $0x130] sm:$0xff]  ;;  %v459_v3 = vld [vmem:[#allocation7 + $0x158] sm:$0xff]  ;;  %v461_v9 = vld [vmem:[#allocation7 + $0x168] sm:$0xff] }
  0xa0   : > { %v749_v4 = vpack.c.bf16 %v454_v0, %v452_v63  ;;  %v751_v5 = vpack.c.bf16 %v459_v3, %v457_v2  ;;  %v458_v7 = vld [vmem:[#allocation7 + $0x150] sm:$0xff]  ;;  %v463_v10 = vld [vmem:[#allocation7 + $0x178] sm:$0xff]  ;;  %v460_v14 = vld [vmem:[#allocation7 + $0x160] sm:$0xff] }
  0xa1   : > { %742 = vmatpush1.bf16.msra.mxu0 %v741_v46  ;;  %v253_v8 = vld [vmem:[#allocation2] sm:$0xff]  ;;  %v753_v11 = vpack.c.bf16 %v458_v7, %v456_v6  ;;  %v755_v13 = vpack.c.bf16 %v463_v10, %v461_v9 }
  0xa2   : > { %744 = vmatprep.subr.bf16.mxu0 %v743_v51  ;;  %722 = vmatpush1.bf16.msra.mxu1 %v721_v54  ;;  %v462_v15 = vld [vmem:[#allocation7 + $0x170] sm:$0xff] }
  0xa3   : > { %724 = vmatprep.subr.bf16.mxu1 %v723_v59  ;;  %v446_v16 = vld [vmem:[#allocation2 + $0x2] sm:$0xff]  ;;  %v544_v22 = vld [vmem:[%s1388_s2] sm:$0x3] }
  0xa4   : > { %702 = vmatmul.mubr.msk.f32.vlgmr.msra.gmra.mrb[0].mxu0 %vm221_vm0, %v348_v60  ;;  %v549_v24 = vrot.slane %v544_v22, %v548_v21  ;;  %v553_v26 = vrot.slane %v544_v22, %v552_v23 }
  0xa5   : > { %746 = vmatpush1.bf16.msra.mxu0 %v745_v61  ;;  %531 = vmatprep.mubr.f32.mxu0 %v1077_v12  ;;  %v757_v12 = vpack.c.bf16 %v462_v15, %v460_v14 }
  0xa6   : > { %748 = vmatprep.subr.bf16.mxu0 %v747_v62  ;;  %726 = vmatpush1.bf16.msra.mxu1 %v725_v1 }
  0xa9   : > { %750 = vmatpush1.bf16.msra.mxu0 %v749_v4  ;;  %701 = vmatmul.mubr.msk.f32.vlgmr.msra.gmra.mrb[0].mxu1 %vm221_vm0, %v253_v8 }
  0xaa   : > { %752 = vmatprep.subr.bf16.mxu0 %v751_v5 }
  0xad   : > { %754 = vmatpush1.bf16.msra.mxu0 %v753_v11 }
  0xae   : > { %756 = vmatprep.subr.bf16.mxu0 %v755_v13 }
  0xb1   : > { %758 = vmatpush1.bf16.msra.mxu0 %v757_v12 }
  0xb4   : > { %703 = vmatmul.mubr.msk.f32.vlgmr.msra.gmra.mrb[0].mxu0 %vm221_vm0, %v446_v16 }
 0x17c   : > { %v339_v18 = vpop.f32.mrb[0].mxu1 }
 0x17d   : > { %v341_v19 = vpop.f32.mrb[1].mxu1 }
 0x187   : > { %v533_v25 = vpop.f32.mrb[0].mxu0 }
 0x188   : > { %v759_v27 = vadd.f32 %v533_v25, %v339_v18  ;;  %v535_v28 = vpop.f32.mrb[1].mxu0 }
 0x189   : > { %v760_v29 = vadd.f32 %v535_v28, %v341_v19 }
 0x18a   : > { %v556_v30 = vadd.f32 %v759_v27, %v549_v24 }
 0x18b   : > { %v557_v31 = vadd.f32 %v760_v29, %v553_v26 }
 0x18c   : > { %v558_v32 = vmax.f32 %v556_v30, 0.0 }
 0x18d   : > { %v559_v33 = vmax.f32 %v557_v31, 0.0 }
 0x18e   : > { %560 = vst [vmem:[%s1297_s27] sm:$0xff] %v558_v32  ;;  %562 = vst [vmem:[%s1297_s27 + $0x10] sm:$0xff] %v558_v32 }
 0x18f   : > { %561 = vst [vmem:[%s1297_s27 + $0x8] sm:$0xff] %v559_v33  ;;  %563 = vst [vmem:[%s1297_s27 + $0x18] sm:$0xff] %v559_v33 }
 0x190   : > { %954 = shalt.err (!%p951_p6)
}
 0x191   : > { %s955_s29 = scalar_lea.hbm %s1318_s6, 512  ;;  %s959_s26 = scalar_lea.hbm %s1389_s3, 2048 }
 0x192   : > { %p956_p10 = scmp.ne.s32.totalorder %s1318_s6, %s955_s29  ;;  %p960_p7 = scmp.lt.u32.totalorder %s1318_s6, %s1389_s3 }
 0x193   : > { %p961_p9 = scmp.lt.u32.totalorder %s959_s26, %s955_s29  ;;  %p963_p13 = scmp.lt.u32.totalorder %s955_s29, %s1318_s6 }
 0x194   : > { %p957_p3 = pnand %p956_p10, %p1418_p0 }
 0x195   : > { %p962_p11 = por %p961_p9, %p960_p7 }
 0x196   : > { %p958_p4 = pneg %p957_p3 }
 0x197   : > { %p964_p2 = por %p963_p13, %p962_p11 }
 0x199   : > { %p965_p5 = pnand %p964_p2, %p958_p4 }
 0x19b   : > { %968 = shalt.err (!%p965_p5)
}
 0x19c   : > { %769 = dma.vmem_to_hbm [thread:$0]  (%p1418_p0), %s1320_s10, 512, %s1318_s6, %s565_s5  }
 0x19d PF: > { %s1419_s7 = sld [smem:[#allocation13_spill]]  ;;  %s1420_s8 = sld [smem:[#allocation15_spill]] }
 0x19e   : > { %p786_p8 = scmp.ge.s32.totalorder %s1067_s22, 2 }
 0x1a3   : > { %s593_s20 = sand.u32 1, %s1419_s7   ;;  %p1421_p12 = scmp.ne.s32.totalorder %s1420_s8, 0 }
 0x1a4   : > { %s594_s12 = scalar_lea.sflag [#allocation6], %s593_s20 }
 0x1a5   : > { %p780_p1 = pnand %p786_p8, %p1421_p12 }
 0x1a7   : > { %1022 = dma.done.wait (!%p780_p1), %s594_s12, 512  }
 0x1a8   : > { %1024 = vsyncadd (!%p780_p1), %s594_s12, 4294966784  ;;  %s20_s22 = sadd.s32 1, %s1067_s22   ;;  %s1422_s18 = sld [smem:[#allocation14_spill]] }
 0x1a9   : > { %p17_p6 = scmp.ge.s32.totalorder %s20_s22, 6   ;;  %s1423_s20 = sld [smem:[#allocation16_spill]] }
 0x1aa   : > { %s1424_s28 = sld [smem:[#allocation17_spill]]  ;;  %s1425_s12 = smov %s1031_s13 }
 0x1ab   : > { %s1426_s13 = smov %s1035_s14  ;;  %s1427_s14 = smov %s1236_s1 }
 0x1ac   : > { %s1428_s15 = smov %s1043_s16  ;;  %s1429_s16 = smov %s1047_s17 }
 0x1ad   : > { %s1430_s17 = smov %s1231_s9  ;;  %s1431_s19 = smov %s1063_s21 }
 0x1ae   :  { %19 = sbr.rel (!%p17_p6) target bundleno = 12 (0xc), region = 102 }
 0x1b0   : > { %s1432_s21 = smov %s1424_s28 }
 0x1b5   :  { %599 = vsyncpa [#allocation5], 1 }
 0x1b6   :  { %601 = vsyncpa [#allocation5 + $0x1], 1 }
 0x1b7   :  { %602 = vsyncpa [#allocation8], 1 }
 0x1b8   :  { %603 = vsyncpa [#allocation6], 1 }
 0x1b9   :  { %605 = vsyncpa [#allocation6 + $0x1], 1 }

</bundles_post_ra>
